<compile_context>
chip_gen: v6e
topology: v6e:2x2x1
jax: 0.10.0
libtpu: 0.0.40
codegen_flags: <defaults>
</compile_context>

<pallas_src>
import math

import jax
import jax.numpy as jnp
from jax import lax
from jax.experimental import pallas as pl
from jax.experimental.pallas import tpu as pltpu

_NEG_INF = -1e9  # matches torch masked_fill_(attn_mask, -1e9)


# --------------------------------------------------------------------------- helpers
def _vmem_capacity_bytes():
    """Physical VMEM per TensorCore; conservative fallback if the query fails."""
    try:
        info = pltpu.get_tpu_info()
        cap = int(getattr(info, "vmem_capacity_bytes", 0))
        if cap > 0:
            return cap
    except Exception:
        pass
    return 64 * 1024 * 1024  # v7x per-core VMEM (smallest of v5e/v6e/v7x)


def _round_down_tile(t, total, align):
    """Round t to a multiple of `align` (>= align), preferring divisors of `total`."""
    if t >= total:
        return total
    t = max(align, (t // align) * align)
    for cand in range(t, align - 1, -align):
        if total % cand == 0:
            return cand
    return t


def _choose_q_tile_single_pass(Lq, Lk, dk, dv, in_bytes, ctx_bytes, attn_bytes,
                               mask_per_row_bytes, budget_bytes, kv_buffers):
    """Largest query tile whose per-grid-step VMEM working set fits the budget
    (single-pass kernel: the full (tq, Lk) score matrix lives in VMEM)."""
    fixed = kv_buffers * Lk * (dk + dv) * in_bytes          # K and V blocks
    per_row = (
        2 * dk * in_bytes                                   # double-buffered Q block
        + mask_per_row_bytes                                # i8 mask (x2) + 32-bit unpack
        + 2 * Lk * attn_bytes                               # double-buffered attn out block
        + 2 * dv * ctx_bytes                                # double-buffered ctx out block
        + 5 * Lk * 4                                        # f32 scores/exp/attn/reductions
        + Lk * max(attn_bytes, in_bytes)                    # attn cast before store
    )
    avail = max(budget_bytes - fixed, 8 * per_row)
    tq = min(int(avail // per_row), 512)
    align = 32 if Lq >= 32 else 8                           # 32: int8 mask native sublane tile
    return _round_down_tile(max(tq, align), Lq, align)


def _choose_flash_tiles(Lq, Lk, dk, dv, in_bytes, mask_materialized, budget_bytes):
    """(tq, tk) for the flash path: tq targets 256 (fills the 256-wide MXU M dim on
    v6e/v7x), tk is a lane-aligned kv tile; both shrink only if VMEM forces it."""
    q_align = 32 if Lq >= 32 else 8
    tq = _round_down_tile(min(Lq, 256), Lq, q_align)
    tk = min(Lk, 512)
    if tk < Lk:
        tk = _round_down_tile(tk, Lk, 128) if Lk >= 128 else Lk

    def footprint(tq_, tk_):
        mask_bytes = (tq_ * tk_ * (2 * 1 + 4)) if mask_materialized else 0
        return (2 * tq_ * dk * in_bytes                     # Q
                + 2 * tk_ * (dk + dv) * in_bytes            # K, V
                + mask_bytes
                + 2 * tq_ * dv * in_bytes                   # ctx out
                + tq_ * (2 * 4 + dv * 4)                    # m / l / acc scratch
                + 4 * tq_ * tk_ * 4)                        # f32 s / p temporaries

    while footprint(tq, tk) > budget_bytes and tk > 128:
        tk = _round_down_tile(tk - 128, Lk, 128)
    while footprint(tq, tk) > budget_bytes and tq > q_align:
        tq = _round_down_tile(tq - q_align, Lq, q_align)
    return tq, tk


def _normalize_mask(attn_mask, B, H, Lq, Lk):
    """Normalize to a 4D int8 mask; broadcast batch/head/query dims stay size-1
    (un-materialized in HBM) -- only the lane (Lk) dim must be materialized."""
    if attn_mask is None:
        return None
    m = attn_mask
    if m.ndim == 2:
        m = m[None, None]
    elif m.ndim == 3:
        m = m[:, None]
    if m.ndim != 4:
        raise ValueError(f"attn_mask must be 2D-4D, got shape {attn_mask.shape}")
    if m.shape[-1] != Lk:
        m = jnp.broadcast_to(m, m.shape[:-1] + (Lk,))
    if m.shape[0] not in (1, B) or m.shape[1] not in (1, H) or m.shape[2] not in (1, Lq):
        raise ValueError(f"attn_mask shape {attn_mask.shape} not broadcastable to "
                         f"({B},{H},{Lq},{Lk})")
    return m.astype(jnp.int8)


# --------------------------------------------------------------------------- kernels
def _make_single_pass_kernel(scale, fold_scale, has_mask):
    """Single-pass SDPA: full Lk resident; writes both ctx and the attn matrix."""

    def kernel(*refs):
        i = 0
        q_ref = refs[i]; i += 1
        k_ref = refs[i]; i += 1
        v_ref = refs[i]; i += 1
        mask_ref = None
        if has_mask:
            mask_ref = refs[i]; i += 1
        ctx_ref = refs[i]; i += 1
        attn_ref = refs[i]

        q = q_ref[0, 0]                               # (tq, dk)
        k = k_ref[0, 0]                               # (Lk, dk)
        v = v_ref[0, 0]                               # (Lk, dv)

        if fold_scale:
            q = q * jnp.asarray(scale, dtype=q.dtype)

        # scores = Q @ K^T without materializing K^T: contract last dims on the MXU.
        scores = lax.dot_general(q, k, (((1,), (1,)), ((), ())),
                                 preferred_element_type=jnp.float32)
        if not fold_scale:
            scores = scores * jnp.float32(scale)

        if has_mask:
            m = mask_ref[0, 0]                        # (tq, Lk) or (1, Lk) int8
            scores = jnp.where(m != 0, jnp.float32(_NEG_INF), scores)

        # Numerically stable softmax; reciprocal-multiply runs on the EUP slot.
        row_max = jnp.max(scores, axis=-1, keepdims=True)
        e = jnp.exp(scores - row_max)
        denom = jnp.sum(e, axis=-1, keepdims=True)
        inv = pl.reciprocal(denom, approx=True)
        attn = e * inv

        ctx = jnp.dot(attn.astype(v.dtype), v, preferred_element_type=jnp.float32)
        ctx_ref[0, 0] = ctx.astype(ctx_ref.dtype)
        attn_ref[0, 0] = attn.astype(attn_ref.dtype)

    return kernel


def _make_flash_kernel(scale, fold_scale, has_mask, Lk, tk, kv_ragged):
    """Flash-style SDPA (ctx only): online softmax over the Lk grid axis."""

    def kernel(*refs):
        i = 0
        q_ref = refs[i]; i += 1
        k_ref = refs[i]; i += 1
        v_ref = refs[i]; i += 1
        mask_ref = None
        if has_mask:
            mask_ref = refs[i]; i += 1
        ctx_ref = refs[i]; i += 1
        m_sc, l_sc, acc_sc = refs[i], refs[i + 1], refs[i + 2]

        kv = pl.program_id(3)

        @pl.when(kv == 0)
        def _():
            m_sc[...] = jnp.full_like(m_sc, -jnp.inf)
            l_sc[...] = jnp.zeros_like(l_sc)
            acc_sc[...] = jnp.zeros_like(acc_sc)

        q = q_ref[0, 0]                               # (tq, dk)
        k = k_ref[0, 0]                               # (tk, dk)
        v = v_ref[0, 0]                               # (tk, dv)

        if fold_scale:
            q = q * jnp.asarray(scale, dtype=q.dtype)
        s = lax.dot_general(q, k, (((1,), (1,)), ((), ())),
                            preferred_element_type=jnp.float32)
        if not fold_scale:
            s = s * jnp.float32(scale)

        if has_mask:
            m = mask_ref[0, 0]                        # (tq, tk) or (1, tk) int8
            s = jnp.where(m != 0, jnp.float32(_NEG_INF), s)
        if kv_ragged:
            # Last kv block is ragged: padded key columns must contribute exactly 0.
            col = kv * tk + lax.broadcasted_iota(jnp.int32, s.shape, 1)
            s = jnp.where(col < Lk, s, -jnp.inf)

        m_prev = m_sc[...]
        m_new = jnp.maximum(m_prev, jnp.max(s, axis=-1, keepdims=True))
        alpha = jnp.exp(m_prev - m_new)
        p = jnp.exp(s - m_new)                        # unnormalized probabilities
        l_sc[...] = alpha * l_sc[...] + jnp.sum(p, axis=-1, keepdims=True)
        acc_sc[...] = alpha * acc_sc[...] + jnp.dot(
            p.astype(v.dtype), v, preferred_element_type=jnp.float32)
        m_sc[...] = m_new

        @pl.when(kv == pl.num_programs(3) - 1)
        def _():
            # Normalize once at the end: tq*dv multiplies instead of tq*Lk.
            inv = pl.reciprocal(l_sc[...], approx=True)
            ctx_ref[0, 0] = (acc_sc[...] * inv).astype(ctx_ref.dtype)

    return kernel


# --------------------------------------------------------------------------- wrapper
def scaled_dot_product_attention(Q, K, V, attn_mask=None, *, d_k=None,
                                 return_attn=True, attn_dtype=None):
    """Q: (B,H,Lq,dk)  K: (B,H,Lk,dk)  V: (B,H,Lk,dv)
    attn_mask: bool/int broadcastable to (B,H,Lq,Lk); nonzero/True => masked out; or None.
    Returns (context, attn) like the torch module, or just context if return_attn=False."""
    B, H, Lq, dk = Q.shape
    Lk = K.shape[2]
    dv = V.shape[3]
    if d_k is None:
        d_k = dk
    scale = 1.0 / math.sqrt(d_k)
    fold_scale = jnp.dtype(Q.dtype) == jnp.dtype(jnp.float32)   # exact only for f32

    mask = _normalize_mask(attn_mask, B, H, Lq, Lk)
    has_mask = mask is not None
    if has_mask:
        mB, mH, mLq = int(mask.shape[0]), int(mask.shape[1]), int(mask.shape[2])
        mask_row_bcast = (mLq == 1 and Lq > 1)
    else:
        mB = mH = 1
        mask_row_bcast = False

    in_bytes = jnp.dtype(Q.dtype).itemsize
    ctx_bytes = in_bytes
    attn_dt = jnp.dtype(attn_dtype) if attn_dtype is not None else jnp.dtype(Q.dtype)

    cap = _vmem_capacity_bytes()
    vmem_limit = max(32 * 1024 * 1024, min((cap * 3) // 4, 100 * 1024 * 1024))
    budget = (vmem_limit * 4) // 5                             # 20% headroom

    if return_attn:
        # ---------------- single-pass path (attn matrix must be materialized anyway)
        kv_block_bytes = Lk * (dk + dv) * in_bytes
        single_buffer_kv = kv_block_bytes > (1 << 20)          # only worth it when big
        kv_buffers = 1 if single_buffer_kv else 2
        mask_per_row = (Lk * (2 * 1 + 4)) if (has_mask and not mask_row_bcast) else 0

        tq = _choose_q_tile_single_pass(Lq, Lk, dk, dv, in_bytes, ctx_bytes,
                                        attn_dt.itemsize, mask_per_row, budget,
                                        kv_buffers)
        nq = pl.cdiv(Lq, tq)
        kernel = _make_single_pass_kernel(scale, fold_scale, has_mask)

        def q_idx(b, h, qi):
            return (b, h, qi, 0)

        def kv_idx(b, h, qi):
            return (b, h, 0, 0)

        def mask_idx(b, h, qi):
            return (b if mB > 1 else 0, h if mH > 1 else 0,
                    0 if mask_row_bcast else qi, 0)

        def build(use_single_buffer_kv):
            kv_mode = ({"pipeline_mode": pl.Buffered(1)}
                       if use_single_buffer_kv else {})
            in_specs = [
                pl.BlockSpec((1, 1, tq, dk), q_idx),
                pl.BlockSpec((1, 1, Lk, dk), kv_idx, **kv_mode),
                pl.BlockSpec((1, 1, Lk, dv), kv_idx, **kv_mode),
            ]
            args = [Q, K, V]
            if has_mask:
                mrows = 1 if mask_row_bcast else tq
                in_specs.append(pl.BlockSpec((1, 1, mrows, Lk), mask_idx))
                args.append(mask)
            out_shapes = (jax.ShapeDtypeStruct((B, H, Lq, dv), Q.dtype),
                          jax.ShapeDtypeStruct((B, H, Lq, Lk), attn_dt))
            out_specs = [pl.BlockSpec((1, 1, tq, dv), q_idx),
                         pl.BlockSpec((1, 1, tq, Lk), q_idx)]
            return pl.pallas_call(
                kernel,
                out_shape=out_shapes,
                grid_spec=pltpu.PrefetchScalarGridSpec(
                    num_scalar_prefetch=0,
                    grid=(B, H, nq),
                    in_specs=in_specs,
                    out_specs=out_specs),
                compiler_params=pltpu.CompilerParams(
                    dimension_semantics=("parallel", "parallel", "parallel"),
                    vmem_limit_bytes=vmem_limit),
            )(*args)

        try:
            ctx, attn = build(single_buffer_kv)
        except Exception:
            if not single_buffer_kv:
                raise
            ctx, attn = build(False)                   # runtime rejected Buffered(1)
        return ctx, attn

    # -------------------- flash path (ctx only): Lk reduction grid axis, online softmax
    tq, tk = _choose_flash_tiles(Lq, Lk, dk, dv, in_bytes,
                                 has_mask and not mask_row_bcast, budget)
    nq = pl.cdiv(Lq, tq)
    nk = pl.cdiv(Lk, tk)
    kv_ragged = (Lk % tk) != 0
    kernel = _make_flash_kernel(scale, fold_scale, has_mask, Lk, tk, kv_ragged)

    def fq_idx(b, h, qi, ki):
        return (b, h, qi, 0)

    def fkv_idx(b, h, qi, ki):
        return (b, h, ki, 0)

    def fmask_idx(b, h, qi, ki):
        return (b if mB > 1 else 0, h if mH > 1 else 0,
                0 if mask_row_bcast else qi, ki)

    in_specs = [
        pl.BlockSpec((1, 1, tq, dk), fq_idx),
        pl.BlockSpec((1, 1, tk, dk), fkv_idx),
        pl.BlockSpec((1, 1, tk, dv), fkv_idx),
    ]
    args = [Q, K, V]
    if has_mask:
        mrows = 1 if mask_row_bcast else tq
        in_specs.append(pl.BlockSpec((1, 1, mrows, tk), fmask_idx))
        args.append(mask)

    ctx = pl.pallas_call(
        kernel,
        out_shape=jax.ShapeDtypeStruct((B, H, Lq, dv), Q.dtype),
        grid_spec=pltpu.PrefetchScalarGridSpec(
            num_scalar_prefetch=0,
            grid=(B, H, nq, nk),
            in_specs=in_specs,
            out_specs=pl.BlockSpec((1, 1, tq, dv), fq_idx),
            scratch_shapes=[pltpu.VMEM((tq, 1), jnp.float32),   # running max
                            pltpu.VMEM((tq, 1), jnp.float32),   # running denom
                            pltpu.VMEM((tq, dv), jnp.float32)]),  # accumulator
        compiler_params=pltpu.CompilerParams(
            dimension_semantics=("parallel", "parallel", "parallel", "arbitrary"),
            vmem_limit_bytes=vmem_limit),
    )(*args)
    return ctx


# --------------------------------------------------------------------------- test
def _reference(Q, K, V, attn_mask, d_k):
    scores = jnp.matmul(Q, jnp.swapaxes(K, -1, -2)) / math.sqrt(d_k)
    if attn_mask is not None:
        scores = jnp.where(attn_mask, -1e9, scores)
    attn = jax.nn.softmax(scores, axis=-1)
    return jnp.matmul(attn, V), attn


if __name__ == "__main__":
    # Small shapes consistent with the module's forward.
    B, H, Lq, Lk, D_K, D_V = 2, 2, 8, 8, 32, 32

    key = jax.random.PRNGKey(0)
    kq, kk, kv, km = jax.random.split(key, 4)
    Q = jax.random.normal(kq, (B, H, Lq, D_K), dtype=jnp.float32)
    K = jax.random.normal(kk, (B, H, Lk, D_K), dtype=jnp.float32)
    V = jax.random.normal(kv, (B, H, Lk, D_V), dtype=jnp.float32)
    # Boolean mask: True => position is masked out (like torch masked_fill_).
    attn_mask = jax.random.bernoulli(km, p=0.2, shape=(B, H, Lq, Lk))

    # 1) Full per-head mask (exactly the torch module's call signature).
    ctx, attn = scaled_dot_product_attention(Q, K, V, attn_mask, d_k=D_K)
    jax.block_until_ready((ctx, attn))
    ctx_ref, attn_ref = _reference(Q, K, V, attn_mask, D_K)
    assert jnp.allclose(ctx, ctx_ref, atol=2e-3, rtol=2e-3), "ctx mismatch"
    assert jnp.allclose(attn, attn_ref, atol=2e-3, rtol=2e-3), "attn mismatch"

    # 2) Head-shared mask path: (B, 1, Lq, Lk) stays un-expanded in HBM.
    shared_mask = attn_mask[:, :1]
    ctx2, attn2 = scaled_dot_product_attention(Q, K, V, shared_mask, d_k=D_K)
    jax.block_until_ready((ctx2, attn2))
    ctx2_ref, attn2_ref = _reference(Q, K, V, shared_mask, D_K)
    assert jnp.allclose(ctx2, ctx2_ref, atol=2e-3, rtol=2e-3), "ctx (shared mask) mismatch"
    assert jnp.allclose(attn2, attn2_ref, atol=2e-3, rtol=2e-3), "attn (shared mask) mismatch"

    # 3) Key-padding mask (B, 1, 1, Lk): query/head dims never materialized in HBM.
    pad_mask = jax.random.bernoulli(jax.random.PRNGKey(1), p=0.2, shape=(B, 1, 1, Lk))
    ctx3, attn3 = scaled_dot_product_attention(Q, K, V, pad_mask, d_k=D_K)
    jax.block_until_ready((ctx3, attn3))
    ctx3_ref, attn3_ref = _reference(Q, K, V, pad_mask, D_K)
    assert jnp.allclose(ctx3, ctx3_ref, atol=2e-3, rtol=2e-3), "ctx (padding mask) mismatch"
    assert jnp.allclose(attn3, attn3_ref, atol=2e-3, rtol=2e-3), "attn (padding mask) mismatch"

    # 4) ctx-only flash path: Lk reduction axis + online softmax, no attn HBM writeback.
    ctx4 = scaled_dot_product_attention(Q, K, V, attn_mask, d_k=D_K, return_attn=False)
    jax.block_until_ready(ctx4)
    assert jnp.allclose(ctx4, ctx_ref, atol=2e-3, rtol=2e-3), "ctx (flash) mismatch"

    # 5) Maskless path: drops the mask HBM stream entirely.
    ctx5, attn5 = scaled_dot_product_attention(Q, K, V, None, d_k=D_K)
    jax.block_until_ready((ctx5, attn5))
    ctx5_ref, attn5_ref = _reference(Q, K, V, None, D_K)
    assert jnp.allclose(ctx5, ctx5_ref, atol=2e-3, rtol=2e-3), "ctx (no mask) mismatch"
    assert jnp.allclose(attn5, attn5_ref, atol=2e-3, rtol=2e-3), "attn (no mask) mismatch"

    print("KERNEL_OK")
</pallas_src>

<mosaic_0001>
module attributes {stable_mosaic.version = 11 : i64} {
  func.func @kernel(%arg0: i32, %arg1: i32, %arg2: i32, %arg3: memref<1x1x8x32xf32, #tpu.memory_space<vmem>>, %arg4: memref<1x1x8x32xf32, #tpu.memory_space<vmem>>, %arg5: memref<1x1x8x32xf32, #tpu.memory_space<vmem>>, %arg6: memref<1x1x8x8xi8, #tpu.memory_space<vmem>>, %arg7: memref<1x1x8x32xf32, #tpu.memory_space<vmem>>, %arg8: memref<1x1x8x8xf32, #tpu.memory_space<vmem>>) attributes {dimension_semantics = [#tpu.dimension_semantics<parallel>, #tpu.dimension_semantics<parallel>, #tpu.dimension_semantics<parallel>], iteration_bounds = array<i64: 2, 2, 1>, scalar_prefetch = 0 : i64, scratch_operands = 0 : i64, tpu.core_type = #tpu.core_type<tc>, window_params = [{transform_indices = @transform_0, window_bounds = array<i64: 1, 1, 8, 32>}, {transform_indices = @transform_1, window_bounds = array<i64: 1, 1, 8, 32>}, {transform_indices = @transform_2, window_bounds = array<i64: 1, 1, 8, 32>}, {transform_indices = @transform_3, window_bounds = array<i64: 1, 1, 8, 8>}, {transform_indices = @transform_4, window_bounds = array<i64: 1, 1, 8, 32>}, {transform_indices = @transform_5, window_bounds = array<i64: 1, 1, 8, 8>}]} {
    %c0 = arith.constant 0 : index
    %c0_0 = arith.constant 0 : index
    %c0_1 = arith.constant 0 : index
    %c0_2 = arith.constant 0 : index
    %0 = vector.load %arg3[%c0, %c0_0, %c0_1, %c0_2] : memref<1x1x8x32xf32, #tpu.memory_space<vmem>>, vector<1x1x8x32xf32>
    %1 = vector.shape_cast %0 : vector<1x1x8x32xf32> to vector<8x32xf32>
    %c0_3 = arith.constant 0 : index
    %c0_4 = arith.constant 0 : index
    %c0_5 = arith.constant 0 : index
    %c0_6 = arith.constant 0 : index
    %2 = vector.load %arg4[%c0_3, %c0_4, %c0_5, %c0_6] : memref<1x1x8x32xf32, #tpu.memory_space<vmem>>, vector<1x1x8x32xf32>
    %3 = vector.shape_cast %2 : vector<1x1x8x32xf32> to vector<8x32xf32>
    %c0_7 = arith.constant 0 : index
    %c0_8 = arith.constant 0 : index
    %c0_9 = arith.constant 0 : index
    %c0_10 = arith.constant 0 : index
    %4 = vector.load %arg5[%c0_7, %c0_8, %c0_9, %c0_10] : memref<1x1x8x32xf32, #tpu.memory_space<vmem>>, vector<1x1x8x32xf32>
    %5 = vector.shape_cast %4 : vector<1x1x8x32xf32> to vector<8x32xf32>
    %cst = arith.constant 0.176776692 : f32
    %6 = vector.broadcast %cst : f32 to vector<8x32xf32>
    %7 = arith.mulf %1, %6 : vector<8x32xf32>
    %cst_11 = arith.constant dense<0.000000e+00> : vector<8x8xf32>
    %8 = tpu.matmul %7, %3, %cst_11 {dimension_numbers = #tpu.dot_dimension_numbers<[1], [1], [0], [0], [0, 0, 1, 0], [], []>} : vector<8x32xf32>, vector<8x32xf32>, vector<8x8xf32> -> vector<8x8xf32>
    %c0_12 = arith.constant 0 : index
    %c0_13 = arith.constant 0 : index
    %c0_14 = arith.constant 0 : index
    %c0_15 = arith.constant 0 : index
    %9 = vector.load %arg6[%c0_12, %c0_13, %c0_14, %c0_15] : memref<1x1x8x8xi8, #tpu.memory_space<vmem>>, vector<1x1x8x8xi8>
    %10 = vector.shape_cast %9 : vector<1x1x8x8xi8> to vector<8x8xi8>
    %c0_i8 = arith.constant 0 : i8
    %11 = vector.broadcast %c0_i8 : i8 to vector<8x8xi8>
    %12 = arith.cmpi ne, %10, %11 : vector<8x8xi8>
    %cst_16 = arith.constant -1.000000e+09 : f32
    %13 = vector.broadcast %cst_16 : f32 to vector<8x8xf32>
    %14 = arith.select %12, %13, %8 : vector<8x8xi1>, vector<8x8xf32>
    %cst_17 = arith.constant dense<0xFF800000> : vector<8xf32>
    %15 = vector.multi_reduction <maximumf>, %14, %cst_17 [1] : vector<8x8xf32> to vector<8xf32>
    %16 = vector.shape_cast %15 : vector<8xf32> to vector<8x1xf32>
    %17 = vector.broadcast %16 : vector<8x1xf32> to vector<8x8xf32>
    %18 = arith.subf %14, %17 : vector<8x8xf32>
    %19 = math.exp %18 : vector<8x8xf32>
    %cst_18 = arith.constant dense<0.000000e+00> : vector<8xf32>
    %20 = vector.multi_reduction <add>, %19, %cst_18 [1] : vector<8x8xf32> to vector<8xf32>
    %21 = vector.shape_cast %20 : vector<8xf32> to vector<8x1xf32>
    %22 = tpu.reciprocal %21 {approx = true} : vector<8x1xf32> -> vector<8x1xf32>
    %23 = vector.broadcast %22 : vector<8x1xf32> to vector<8x8xf32>
    %24 = arith.mulf %19, %23 : vector<8x8xf32>
    %cst_19 = arith.constant dense<0.000000e+00> : vector<8x32xf32>
    %25 = tpu.matmul %24, %5, %cst_19 {dimension_numbers = #tpu.dot_dimension_numbers<[1], [0], [0], [1], [0, 0, 1, 1], [], []>} : vector<8x8xf32>, vector<8x32xf32>, vector<8x32xf32> -> vector<8x32xf32>
    %c0_20 = arith.constant 0 : index
    %c0_21 = arith.constant 0 : index
    %c0_22 = arith.constant 0 : index
    %c0_23 = arith.constant 0 : index
    %26 = vector.load %arg7[%c0_20, %c0_21, %c0_22, %c0_23] : memref<1x1x8x32xf32, #tpu.memory_space<vmem>>, vector<1x1x8x32xf32>
    %27 = vector.shape_cast %26 : vector<1x1x8x32xf32> to vector<8x32xf32>
    %28 = vector.shape_cast %25 : vector<8x32xf32> to vector<1x1x8x32xf32>
    tpu.vector_store %arg7[%c0_20, %c0_21, %c0_22, %c0_23], %28 {strides = array<i32>} : memref<1x1x8x32xf32, #tpu.memory_space<vmem>>, vector<1x1x8x32xf32>,
    %c0_24 = arith.constant 0 : index
    %c0_25 = arith.constant 0 : index
    %c0_26 = arith.constant 0 : index
    %c0_27 = arith.constant 0 : index
    %29 = vector.load %arg8[%c0_24, %c0_25, %c0_26, %c0_27] : memref<1x1x8x8xf32, #tpu.memory_space<vmem>>, vector<1x1x8x8xf32>
    %30 = vector.shape_cast %29 : vector<1x1x8x8xf32> to vector<8x8xf32>
    %31 = vector.shape_cast %24 : vector<8x8xf32> to vector<1x1x8x8xf32>
    tpu.vector_store %arg8[%c0_24, %c0_25, %c0_26, %c0_27], %31 {strides = array<i32>} : memref<1x1x8x8xf32, #tpu.memory_space<vmem>>, vector<1x1x8x8xf32>,
    return
  }
  func.func @transform_0(%arg0: i32, %arg1: i32, %arg2: i32) -> (i32, i32, i32, i32) {
    %c0_i32 = arith.constant 0 : i32
    %c0_i32_0 = arith.constant 0 : i32
    return %arg0, %arg1, %arg2, %c0_i32 : i32, i32, i32, i32
  }
  func.func @transform_1(%arg0: i32, %arg1: i32, %arg2: i32) -> (i32, i32, i32, i32) {
    %c0_i32 = arith.constant 0 : i32
    %c0_i32_0 = arith.constant 0 : i32
    %c0_i32_1 = arith.constant 0 : i32
    return %arg0, %arg1, %c0_i32, %c0_i32_0 : i32, i32, i32, i32
  }
  func.func @transform_2(%arg0: i32, %arg1: i32, %arg2: i32) -> (i32, i32, i32, i32) {
    %c0_i32 = arith.constant 0 : i32
    %c0_i32_0 = arith.constant 0 : i32
    %c0_i32_1 = arith.constant 0 : i32
    return %arg0, %arg1, %c0_i32, %c0_i32_0 : i32, i32, i32, i32
  }
  func.func @transform_3(%arg0: i32, %arg1: i32, %arg2: i32) -> (i32, i32, i32, i32) {
    %c0_i32 = arith.constant 0 : i32
    %c0_i32_0 = arith.constant 0 : i32
    return %arg0, %arg1, %arg2, %c0_i32 : i32, i32, i32, i32
  }
  func.func @transform_4(%arg0: i32, %arg1: i32, %arg2: i32) -> (i32, i32, i32, i32) {
    %c0_i32 = arith.constant 0 : i32
    %c0_i32_0 = arith.constant 0 : i32
    return %arg0, %arg1, %arg2, %c0_i32 : i32, i32, i32, i32
  }
  func.func @transform_5(%arg0: i32, %arg1: i32, %arg2: i32) -> (i32, i32, i32, i32) {
    %c0_i32 = arith.constant 0 : i32
    %c0_i32_0 = arith.constant 0 : i32
    return %arg0, %arg1, %arg2, %c0_i32 : i32, i32, i32, i32
  }
}

</mosaic_0001>

<bundles_post_ra>
// kernel: tpu_custom_call.1
= control target key start
LH: loop header
LB: loop body
LE: loop exit
PB: predicated region body
PF: predicated region fallthrough
CT: control target
= control target key end

     0   :  { %s1545_s0 = inlined_call_operand.hbm [shape: f32[2,2,8,32], index: 0, kind: input, shape index: {}]   ;;  %s1546_s1 = inlined_call_operand.hbm [shape: f32[2,2,8,32], index: 1, kind: input, shape index: {}]   ;;  %s1547_s2 = inlined_call_operand.hbm [shape: f32[2,2,8,32], index: 2, kind: input, shape index: {}]   ;;  %s1548_s3 = inlined_call_operand.hbm [shape: s8[2,2,8,8], index: 3, kind: input, shape index: {}]   ;;  %s1549_s4 = inlined_call_operand.hbm [shape: f32[2,2,8,32], index: 4, kind: output, shape index: {0}]   ;;  %s1550_s5 = inlined_call_operand.hbm [shape: f32[2,2,8,8], index: 5, kind: output, shape index: {1}]  }
   0x1   :  { %1560 = sst [smem:[#allocation27_spill]] %s1546_s1 }
   0x2   :  { %11 = vsyncpa [#allocation3], 0 }
   0x3   :  { %13 = vsyncpa [#allocation3 + $0x1], 0 }
   0x4   :  { %14 = vsyncpa [#allocation6], 0 }
   0x5   :  { %16 = vsyncpa [#allocation6 + $0x1], 0 }
   0x6   :  { %17 = vsyncpa [#allocation9], 0 }
   0x7   :  { %19 = vsyncpa [#allocation9 + $0x1], 0 }
   0x8   :  { %20 = vsyncpa [#allocation4], 0 }
   0x9   :  { %22 = vsyncpa [#allocation4 + $0x1], 0 }
   0xa   :  { %23 = vsyncpa [#allocation12], 0 }
   0xb   :  { %25 = vsyncpa [#allocation12 + $0x1], 0  ;;  %s1260_s18 = smov 0   ;;  %s1262_s19 = smov 0  }
   0xc   :  { %s1264_s20 = smov 0   ;;  %s1266_s21 = smov 0  }
   0xd   :  { %s1268_s22 = smov 0   ;;  %s1270_s23 = smov 0  }
   0xe   :  { %s1272_s24 = smov 0   ;;  %s1274_s25 = smov 0  }
   0xf LB: > { %1561 = sst [smem:[#allocation18_spill]] %s1191_s18  ;;  %s1301_s26 = sadd.s32 4294967295, %s1219_s25   ;;  %s1219_s25 = sphi %s1274_s25, %s31_s25   ;;  %s1215_s24 = sphi %s1272_s24, %s1585_s24   ;;  %s1211_s23 = sphi %s1270_s23, %s1584_s23   ;;  %s1207_s22 = sphi %s1268_s22, %s1583_s22   ;;  %s1203_s21 = sphi %s1266_s21, %s1582_s21   ;;  %s1199_s20 = sphi %s1264_s20, %s1581_s20   ;;  %s1195_s19 = sphi %s1262_s19, %s1587_s19   ;;  %s1191_s18 = sphi %s1260_s18, %s1586_s18  }
  0x10   : > { %1562 = sst [smem:[#allocation19_spill]] %s1199_s20  ;;  %s821_s27 = sadd.s32 4294967294, %s1219_s25  }
  0x11   : > { %1563 = sst [smem:[#allocation20_spill]] %s1211_s23  ;;  %s46_s28 = sadd.s32 1, %s1211_s23 }
  0x12   : > { %1564 = sst [smem:[#allocation21_spill]] %s1215_s24  ;;  %s50_s29 = sadd.s32 1, %s1215_s24 }
  0x13   : > { %1565 = sst [smem:[#allocation22_spill]] %s1219_s25  ;;  %p48_p0 = scmp.ge.s32.totalorder %s46_s28, 2 }
  0x14   : > { %s61_s30 = sadd.s32 1, %s1199_s20  ;;  %p68_p1 = scmp.ne.s32.totalorder %s1199_s20, %s1195_s19 }
  0x15   : > { %p69_p2 = scmp.eq.s32.totalorder %s1219_s25, 0  ;;  %s1589_s28 = smov (%p48_p0, %s46_s28), 0 }
  0x16   : > { %1566 = sst [smem:[#allocation23_spill]] %s1589_s28  ;;  %s1591_s29 = smov (!%p48_p0, %s50_s29), %s1215_s24 }
  0x17   : > { %s55_s6 = ssub.s32 %s1211_s23, %s1589_s28  ;;  %p1315_p3 = por %p69_p2, %p68_p1 }
  0x18   : > { %p52_p4 = scmp.ge.s32.totalorder %s1591_s29, 2  ;;  %p74_p5 = scmp.ne.s32.totalorder %s1195_s19, %s1191_s18 }
  0x19   : > { %p75_p6 = scmp.eq.s32.totalorder %s1301_s26, 0  ;;  %p188_p7 = scmp.eq.s32.totalorder %s1301_s26, 3 }
  0x1a   : > { %s1593_s29 = smov (%p52_p4, %s1591_s29), 0  ;;  %p194_p10 = scmp.eq.s32.totalorder %s821_s27, 3 }
  0x1b   : > { %1568 = sst [smem:[#allocation24_spill]] %s1593_s29  ;;  %p1325_p8 = por %p75_p6, %p74_p5 }
  0x1c   : > { %p1329_p9 = por %p188_p7, %p68_p1  ;;  %s54_s10 = ssub.s32 %s1215_s24, %s1593_s29 }
  0x1d   : > { %s56_s11 = sor.u32 %s55_s6, %s54_s10  ;;  %p1335_p12 = por %p194_p10, %p74_p5 }
  0x1e   : > { %p59_p11 = scmp.eq.s32.totalorder %s56_s11, 0  ;;  %p900_p13 = scmp.lt.s32.totalorder %s1219_s25, 4 }
  0x1f   : > { %s1571_s12 = scalar_select %p1335_p12, 1, 0 }
  0x20   : > { %s1341_s13 = sand.u32 1, %s1199_s20   ;;  %s825_s16 = sshll.u32 %s1215_s24, 1 }
  0x21   : > { %1572 = sst [smem:[#allocation25_spill]] %s1571_s12  ;;  %s1347_s15 = sshll.u32 %s1341_s13, 3 }
  0x22   : > { %s1344_s14 = scalar_select %p59_p11, %s1199_s20, %s61_s30  }
  0x23   : > { %s1351_s17 = sadd.s32 %s1211_s23, %s825_s16  ;;  %p1355_p0 = pnand %p900_p13, %p1315_p3 }
  0x24   : > { %1573 = sst [smem:[#allocation26_spill]] %s1344_s14  ;;  %s1360_s6 = sshll.u32 %s1351_s17, 7 }
  0x25   : > { %s265_s10 = sand.u32 1, %s1219_s25   ;;  %s1575_s1 = sld [smem:[#allocation27_spill]] }
  0x26   : > { %s269_s28 = scalar_lea.vmem [#allocation5], %s1347_s15  ;;  %p836_p1 = scmp.ge.s32.totalorder %s1219_s25, 1 }
  0x27   : > { %s278_s24 = sshll.u32 %s269_s28, 4  ;;  %p324_p2 = scmp.lt.s32.totalorder %s1219_s25, 5  ;;  %s279_s24 = int_to_ptr.vmem [resolvable:$true] %s278_s24 }
  0x28   : > { %s1370_s7 = scalar_lea.sflag [#allocation6], %s265_s10  ;;  %p975_p3 = pneg %p1355_p0 }
  0x29   : > { %s986_s16 = scalar_lea.vmem %s279_s24, 128  ;;  %s1221_s23 = smov [#allocation5]  }
  0x2a   : > { %p987_p4 = scmp.ne.s32.totalorder %s279_s24, %s986_s16  ;;  %s991_s14 = sshll.u32 %s1221_s23, 4  ;;  %s992_s14 = int_to_ptr.vmem [resolvable:$false] %s991_s14 }
  0x2b   : > { %s276_s29 = scalar_lea.hbm %s1575_s1, %s1360_s6  ;;  %s993_s30 = scalar_lea.vmem %s992_s14, 256 }
  0x2c   : > { %p989_p5 = pnand %p987_p4, %p975_p3  ;;  %p994_p7 = scmp.lt.s32.totalorder %s279_s24, %s992_s14 }
  0x2d   : > { %p995_p10 = scmp.lt.s32.totalorder %s993_s30, %s986_s16 }
  0x2e   : > { %p990_p6 = pneg %p989_p5 }
  0x2f   : > { %p996_p11 = por %p995_p10, %p994_p7 }
  0x31   : > { %p997_p13 = pnand %p996_p11, %p990_p6 }
  0x33   : > { %1000 = shalt.err (!%p997_p13)
}
  0x34   : > { %886 = dma.hbm_to_vmem [thread:$0]  (!%p1355_p0), %s276_s29, 128, %s279_s24, %s1370_s7  }
  0x35   : > { %p1384_p4 = pnand %p836_p1, %p324_p2  ;;  %s256_s10 = scalar_lea.hbm %s1545_s0, %s1360_s6 }
  0x36   : > { %s248_s11 = scalar_lea.vmem [#allocation2], %s1347_s15  ;;  %s296_s20 = scalar_lea.hbm %s1547_s2, %s1360_s6 }
  0x37   : > { %s258_s16 = sshll.u32 %s248_s11, 4  ;;  %s245_s12 = scalar_lea.sflag [#allocation3], %s1341_s13  ;;  %s259_s16 = int_to_ptr.vmem [resolvable:$true] %s258_s16 }
  0x38   : > { %s1014_s18 = scalar_lea.vmem %s259_s16, 128  ;;  %s1222_s24 = smov [#allocation2]  }
  0x39   : > { %p1015_p5 = scmp.ne.s32.totalorder %s259_s16, %s1014_s18  ;;  %s1019_s29 = sshll.u32 %s1222_s24, 4  ;;  %s1020_s29 = int_to_ptr.vmem [resolvable:$false] %s1019_s29 }
  0x3a   : > { %s1021_s25 = scalar_lea.vmem %s1020_s29, 256  ;;  %p1022_p6 = scmp.lt.s32.totalorder %s259_s16, %s1020_s29 }
  0x3b   : > { %p1017_p1 = pnand %p1015_p5, %p975_p3  ;;  %p1023_p7 = scmp.lt.s32.totalorder %s1021_s25, %s1014_s18 }
  0x3d   : > { %p1018_p2 = pneg %p1017_p1  ;;  %p1024_p10 = por %p1023_p7, %p1022_p6 }
  0x3f   : > { %p1025_p11 = pnand %p1024_p10, %p1018_p2 }
  0x41   : > { %1028 = shalt.err (!%p1025_p11)
}
  0x42   : > { %883 = dma.hbm_to_vmem [thread:$0]  (!%p1355_p0), %s256_s10, 128, %s259_s16, %s245_s12  }
  0x43   : > { %s289_s1 = scalar_lea.vmem [#allocation7], %s1347_s15  ;;  %s833_s14 = sshll.u32 %s1341_s13, 1 }
  0x44   : > { %s298_s28 = sshll.u32 %s289_s1, 4  ;;  %s1223_s18 = smov [#allocation7]   ;;  %s299_s28 = int_to_ptr.vmem [resolvable:$true] %s298_s28 }
  0x45   : > { %s1042_s11 = scalar_lea.vmem %s299_s28, 128  ;;  %s1047_s25 = sshll.u32 %s1223_s18, 4  ;;  %s1048_s25 = int_to_ptr.vmem [resolvable:$false] %s1047_s25 }
  0x46   : > { %p1043_p13 = scmp.ne.s32.totalorder %s299_s28, %s1042_s11  ;;  %s1049_s30 = scalar_lea.vmem %s1048_s25, 256 }
  0x47   : > { %p1050_p2 = scmp.lt.s32.totalorder %s299_s28, %s1048_s25  ;;  %p1051_p6 = scmp.lt.s32.totalorder %s1049_s30, %s1042_s11 }
  0x48   : > { %p1045_p5 = pnand %p1043_p13, %p975_p3 }
  0x49   : > { %p1052_p7 = por %p1051_p6, %p1050_p2 }
  0x4a   : > { %p1046_p1 = pneg %p1045_p5 }
  0x4c   : > { %p1053_p10 = pnand %p1052_p7, %p1046_p1 }
  0x4e   : > { %1056 = shalt.err (!%p1053_p10)
}
  0x4f   : > { %889 = dma.hbm_to_vmem [thread:$0]  (!%p1355_p0), %s296_s20, 128, %s299_s28, %s1370_s7  }
  0x50   : > { %s835_s10 = sshll.u32 %s1351_s17, 5  ;;  %s309_s1 = scalar_lea.vmem [#allocation8], %s833_s14 }
  0x51   : > { %s317_s29 = scalar_lea.hbm %s1548_s3, %s835_s10  ;;  %s319_s11 = sshll.u32 %s309_s1, 4  ;;  %s320_s11 = int_to_ptr.vmem [resolvable:$true] %s319_s11 }
  0x52   : > { %s306_s18 = scalar_lea.sflag [#allocation9], %s1341_s13  ;;  %s1070_s25 = scalar_lea.vmem %s320_s11, 32 }
  0x53   : > { %p1071_p11 = scmp.ne.s32.totalorder %s320_s11, %s1070_s25  ;;  %s1224_s6 = smov [#allocation8]  }
  0x54   : > { %s1075_s30 = sshll.u32 %s1224_s6, 4  ;;  %s1076_s30 = int_to_ptr.vmem [resolvable:$false] %s1075_s30 }
  0x55   : > { %p1073_p13 = pnand %p1071_p11, %p975_p3  ;;  %s1077_s12 = scalar_lea.vmem %s1076_s30, 64 }
  0x56   : > { %p1078_p1 = scmp.lt.s32.totalorder %s320_s11, %s1076_s30  ;;  %p1079_p2 = scmp.lt.s32.totalorder %s1077_s12, %s1070_s25 }
  0x57   : > { %p1074_p5 = pneg %p1073_p13 }
  0x58   : > { %p1080_p6 = por %p1079_p2, %p1078_p1 }
  0x5a   : > { %p1081_p7 = pnand %p1080_p6, %p1074_p5 }
  0x5c   : > { %1084 = shalt.err (!%p1081_p7)
}
  0x5d   : > { %892 = dma.hbm_to_vmem [thread:$0]  (!%p1355_p0), %s317_s29, 32, %s320_s11, %s306_s18  }
  0x5e   : > { %328 = sbr.rel (%p1384_p4) target bundleno = 825 (0x339), region = 36  ;;  %s1429_s20 = sand.u32 (!%p1384_p4), 1, %s1195_s19  }
  0x5f   : > { %s1432_s13 = sshll.u32 (!%p1384_p4), %s1429_s20, 3  ;;  %s331_s17 = scalar_lea.sflag (!%p1384_p4), [#allocation3], %s1429_s20 }
  0x60   : > { %s334_s7 = scalar_lea.vmem (!%p1384_p4), [#allocation2], %s1432_s13 }
  0x63   : > { %1170 = dma.done.wait (%p1325_p8), %s331_s17, 128  }
  0x64   : > { %1172 = vsyncadd (%p1325_p8), %s331_s17, 4294967168  ;;  %s339_s27 = sand.u32 1, %s1301_s26   ;;  %s343_s28 = scalar_lea.vmem [#allocation5], %s1432_s13 }
  0x65   : > { %s340_s23 = scalar_lea.sflag [#allocation6], %s339_s27 }
  0x66   : > { %1174 = dma.done.wait (%p1325_p8), %s340_s23, 256  }
  0x67   : > { %1176 = vsyncadd (%p1325_p8), %s340_s23, 4294967040  ;;  %s840_s14 = sshll.u32 %s1429_s20, 1  ;;  %s352_s15 = scalar_lea.vmem [#allocation7], %s1432_s13 }
  0x68   : > { %s358_s10 = scalar_lea.sflag [#allocation9], %s1429_s20  ;;  %s361_s16 = scalar_lea.vmem [#allocation8], %s840_s14 }
  0x69   : > { %1178 = dma.done.wait (%p1325_p8), %s358_s10, 32  }
  0x6a   : > { %1180 = vsyncadd (%p1325_p8), %s358_s10, 4294967264  ;;  %v1225_v0 = vmov 0.0   ;;  %vm1226_vm0 = vmmov 0   ;;  %vm414_vm1 = vcmask 261120   ;;  %v411_v1 = vld [vmem:[%s343_s28] sm:$0xff]  ;;  %v410_v2 = vld [vmem:[%s334_s7] sm:$0xff] }
  0x6b   : > { %858 = vmatprep.subr.mxu0 %v1225_v0  ;;  %860 = vmatprep.mubr.msk.f32.mxu0 %vm1226_vm0, %v1225_v0  ;;  %v413_v3 = vmul.f32 0.17677669, %v410_v2  ;;  %v491_v4 = vld [vmem:[%s361_s16] sm:$0x3]  ;;  %v1227_v5 = vmov 0   ;;  %vm497_vm4 = vcmask 64512  }
  0x6c   : > { %863 = vmatprep.subr.mxu1 %v1225_v0  ;;  %865 = vmatprep.mubr.msk.f32.mxu1 %vm1226_vm0, %v1225_v0  ;;  %vm492_vm2 = vnez %v491_v4  ;;  %v412_v17 = vld [vmem:[%s352_s15] sm:$0xff]  ;;  %s407_s26 = scalar_lea.vmem [#allocation11], %s1432_s13  ;;  %s848_s8 = sshll.u32 %s1207_s22, 1 }
  0x6d   : > { %859 = vmatpush3.xpose.msk.msra.mxu0 %vm414_vm1, %v411_v1  ;;  %v493_v6 = vsel %vm492_vm2, 16843009, %v1227_v5  ;;  %864 = vmatpush3.msra.mxu1 %v412_v17  ;;  %s1464_s24 = sadd.s32 %s1203_s21, %s848_s8  ;;  %s622_s25 = sshll.u32 %s407_s26, 4  ;;  %s623_s25 = int_to_ptr.vmem [resolvable:$true] %s622_s25 }
  0x6e   : > { %v494_v7 = vunpack.c.0.s8 %v493_v6  ;;  %s849_s29 = sshll.u32 %s1464_s24, 7  ;;  %s590_s6 = scalar_lea.sflag [#allocation12], %s1429_s20 }
  0x6f   : > { %s620_s18 = scalar_lea.hbm %s1550_s5, %s849_s29  ;;  %s1085_s30 = scalar_lea.vmem %s623_s25, 128 }
  0x70   : > { %861 = vmatmul.mubr.msk.f32.vlgmr.msra.gmra.mxu0 %vm414_vm1, %v413_v3  ;;  %vm495_vm3 = vcmp.ne.s32.totalorder %v494_v7, 0  ;;  %p1086_p8 = scmp.ne.s32.totalorder %s623_s25, %s1085_s30  ;;  %s1228_s12 = smov [#allocation11]  }
  0x71   : > { %s1089_s22 = sshll.u32 %s1228_s12, 4  ;;  %s1090_s22 = int_to_ptr.vmem [resolvable:$false] %s1089_s22 }
  0x72   : > { %p1087_p0 = pnand %p1086_p8, %p1329_p9  ;;  %s1091_s21 = scalar_lea.vmem %s1090_s22, 256 }
  0x73   : > { %p1092_p4 = scmp.lt.s32.totalorder %s623_s25, %s1090_s22  ;;  %p1093_p10 = scmp.lt.s32.totalorder %s1091_s21, %s1085_s30 }
  0x74   : > { %p1088_p3 = pneg %p1087_p0 }
  0x75   : > { %p1094_p11 = por %p1093_p10, %p1092_p4 }
  0x77   : > { %p1095_p13 = pnand %p1094_p11, %p1088_p3 }
 0x130   : > { %v487_v8 = vpop.f32.mrf.mxu0 }
 0x131   : > { %v496_v9 = vsel %vm495_vm3, -1e+09, %v487_v8 }
 0x132   : > { %v862_v10 = vpop.f32.mrf.mxu0  ;;  %v498_v11 = vsel %vm497_vm4, %v496_v9, -inf }
 0x133   : > { %499 = vmax.xlane.f32.xlu0 %v498_v11 }
 0x1bc   : > { %v500_v12 = vpop.xlane.xlu0 %499 }
 0x1bd   : > { %v501_v13 = vsub.f32 %v496_v9, %v500_v12 }
 0x1bf   : > { %v502_v14 = vmul.f32 1.442695, %v501_v13 }
 0x1c1   : > { %969 = vpow2.f32 %v502_v14 }
 0x1ce   : > { %v970_v15 = vpop.eup %969 }
 0x1cf   : > { %v504_v16 = vsel %vm497_vm4, %v970_v15, 0.0 }
 0x1d0   : > { %505 = vadd.xlane.f32.xlu0 %v504_v16 }
 0x259   : > { %v506_v18 = vpop.xlane.xlu0 %505 }
 0x25a   : > { %971 = vrcp.f32 %v506_v18 }
 0x267   : > { %v972_v19 = vpop.eup %971 }
 0x268   : > { %v508_v20 = vmul.f32 %v972_v19, %v970_v15 }
 0x26a   : > { %866 = vmatmul.mubr.msk.f32.vlgmr.msra.gmra.mxu1 %vm497_vm4, %v508_v20  ;;  %583 = vst.msk [vmem:[%s407_s26] sm:$0xff] %vm497_vm4, %v508_v20 }
 0x26b   : > { %1098 = shalt.err (!%p1095_p13)
}
 0x26c   : > { %s1099_s17 = scalar_lea.hbm %s620_s18, 128  ;;  %s1103_s23 = scalar_lea.hbm %s1550_s5, 512 }
 0x26d   : > { %p1100_p5 = scmp.ne.s32.totalorder %s620_s18, %s1099_s17  ;;  %p1104_p6 = scmp.lt.s32.totalorder %s620_s18, %s1550_s5 }
 0x26e   : > { %p1105_p7 = scmp.lt.s32.totalorder %s1103_s23, %s1099_s17 }
 0x26f   : > { %p1101_p1 = pnand %p1100_p5, %p1329_p9 }
 0x270   : > { %p1106_p8 = por %p1105_p7, %p1104_p6 }
 0x271   : > { %p1102_p2 = pneg %p1101_p1 }
 0x273   : > { %p1107_p0 = pnand %p1106_p8, %p1102_p2 }
 0x275   : > { %1110 = shalt.err (!%p1107_p0)
}
 0x276   : > { %877 = dma.vmem_to_hbm [thread:$0]  (%p1329_p9), %s623_s25, 128, %s620_s18, %s590_s6  }
 0x277   : > { %s400_s15 = scalar_lea.vmem [#allocation10], %s1432_s13  ;;  %s1491_s8 = scalar_lea.hbm %s1549_s4, %s849_s29 }
 0x278   : > { %s606_s10 = sshll.u32 %s400_s15, 4  ;;  %s585_s1 = scalar_lea.sflag [#allocation4], %s1429_s20  ;;  %s1493_s10 = int_to_ptr.vmem [resolvable:$true] %s606_s10 }
 0x279   : > { %s1111_s11 = scalar_lea.vmem %s1493_s10, 128  ;;  %s1229_s13 = smov [#allocation10]  }
 0x27a   : > { %p1112_p3 = scmp.ne.s32.totalorder %s1493_s10, %s1111_s11  ;;  %s1115_s24 = sshll.u32 %s1229_s13, 4  ;;  %s1116_s24 = int_to_ptr.vmem [resolvable:$false] %s1115_s24 }
 0x27b   : > { %s1117_s29 = scalar_lea.vmem %s1116_s24, 256  ;;  %p1118_p11 = scmp.lt.s32.totalorder %s1493_s10, %s1116_s24 }
 0x27c   : > { %p1113_p4 = pnand %p1112_p3, %p1329_p9  ;;  %p1119_p13 = scmp.lt.s32.totalorder %s1117_s29, %s1111_s11 }
 0x27e   : > { %p1114_p10 = pneg %p1113_p4  ;;  %p1120_p5 = por %p1119_p13, %p1118_p11 }
 0x280   : > { %p1121_p1 = pnand %p1120_p5, %p1114_p10 }
 0x32a   : > { %v578_v21 = vpop.f32.mrf.mxu1 }
 0x32b   : > { %582 = vst.msk [vmem:[%s400_s15] sm:$0xff] %vm414_vm1, %v578_v21 }
 0x32c   : > { %v867_v22 = vpop.f32.mrf.mxu1 }
 0x32d   : > { %1124 = shalt.err (!%p1121_p1)
}
 0x32e   : > { %s1125_s18 = scalar_lea.hbm %s1491_s8, 128  ;;  %s1129_s6 = scalar_lea.hbm %s1549_s4, 512 }
 0x32f   : > { %p1126_p2 = scmp.ne.s32.totalorder %s1491_s8, %s1125_s18  ;;  %p1130_p8 = scmp.lt.s32.totalorder %s1491_s8, %s1549_s4 }
 0x330   : > { %p1131_p0 = scmp.lt.s32.totalorder %s1129_s6, %s1125_s18 }
 0x331   : > { %p1127_p6 = pnand %p1126_p2, %p1329_p9 }
 0x332   : > { %p1132_p3 = por %p1131_p0, %p1130_p8 }
 0x333   : > { %p1128_p7 = pneg %p1127_p6 }
 0x335   : > { %p1133_p4 = pnand %p1132_p3, %p1128_p7 }
 0x337   : > { %1136 = shalt.err (!%p1133_p4)
}
 0x338   : > { %876 = dma.vmem_to_hbm [thread:$0]  (%p1329_p9), %s1493_s10, 128, %s1491_s8, %s585_s1  }
 0x339 PF: > { %s1577_s22 = sld [smem:[#allocation22_spill]] }
 0x33a   : > { %s1578_s21 = sld [smem:[#allocation18_spill]] }
 0x33f   : > { %p901_p10 = scmp.ge.s32.totalorder %s1577_s22, 2 }
 0x340   : > { %s634_s7 = sand.u32 1, %s1578_s21  }
 0x341   : > { %p894_p11 = pnand %p901_p10, %p1335_p12  ;;  %s635_s27 = scalar_lea.sflag [#allocation4], %s634_s7 }
 0x343   : > { %p895_p13 = pneg %p894_p11 }
 0x345   : > { %1182 = dma.done.wait (%p895_p13), %s635_s27, 128  }
 0x346   : > { %1184 = vsyncadd (%p895_p13), %s635_s27, 4294967168  ;;  %s644_s23 = scalar_lea.sflag [#allocation12], %s634_s7 }
 0x347   : > { %1186 = dma.done.wait (%p895_p13), %s644_s23, 128  }
 0x348   : > { %1188 = vsyncadd (%p895_p13), %s644_s23, 4294967168  ;;  %s31_s25 = sadd.s32 1, %s1577_s22   ;;  %s1580_s9 = sld [smem:[#allocation19_spill]] }
 0x349   : > { %p28_p5 = scmp.ge.s32.totalorder %s31_s25, 6   ;;  %s1581_s20 = sld [smem:[#allocation26_spill]] }
 0x34a   : > { %s1582_s21 = sld [smem:[#allocation20_spill]]  ;;  %s1586_s18 = smov %s1195_s19 }
 0x34b   : > { %s1583_s22 = sld [smem:[#allocation21_spill]]  ;;  %30 = sbr.rel (!%p28_p5) target bundleno = 15 (0xf), region = 135 }
 0x34c   : > { %s1584_s23 = sld [smem:[#allocation23_spill]] }
 0x34d   : > { %s1585_s24 = sld [smem:[#allocation24_spill]] }
 0x34e   : > { %s1587_s19 = smov %s1580_s9 }
 0x350   :  { %649 = vsyncpa [#allocation3], 1 }
 0x351   :  { %651 = vsyncpa [#allocation3 + $0x1], 1 }
 0x352   :  { %652 = vsyncpa [#allocation6], 1 }
 0x353   :  { %654 = vsyncpa [#allocation6 + $0x1], 1 }
 0x354   :  { %655 = vsyncpa [#allocation9], 1 }
 0x355   :  { %657 = vsyncpa [#allocation9 + $0x1], 1 }
 0x356   :  { %658 = vsyncpa [#allocation4], 1 }
 0x357   :  { %660 = vsyncpa [#allocation4 + $0x1], 1 }
 0x358   :  { %661 = vsyncpa [#allocation12], 1 }
 0x359   :  { %663 = vsyncpa [#allocation12 + $0x1], 1 }

</bundles_post_ra>
